<compile_context>
chip_gen: v7x
topology: tpu7x:2x2x1
jax: 0.10.0
libtpu: 0.0.40
codegen_flags: <defaults>
</compile_context>

<pallas_src>
import numpy as np
import jax
import jax.numpy as jnp
from jax.experimental import pallas as pl
from jax.experimental.pallas import tpu as pltpu

_NEG_BIG = -1e30  # finite pad for padded class lanes: exp() -> 0, no NaN risk


def make_ldam_kernel(s: float, n_valid: int, tile_n: int):
    """Pallas kernel closure with static scale s, true batch size, tile size."""

    def ldam_kernel(x_ref, t_ref, m_ref, out_ref):
        pid = pl.program_id(0)

        x = x_ref[...].astype(jnp.float32)      # (TILE_N, C_pad), cast in-kernel
        t = t_ref[...]                          # (TILE_N, 1) int32
        m = m_ref[...]                          # (1, C_pad) float32
        tn, c_pad = x.shape

        # one-hot mask of the target class per row (torch scatter_)
        cls_ids = jax.lax.broadcasted_iota(jnp.int32, (tn, c_pad), 1)
        mask = cls_ids == t                     # (TILE_N, C_pad) bool

        # subtract the per-class margin only at the true-class position, then scale
        delta = jnp.where(mask, m, 0.0)         # single select, mask reused below
        scaled = jnp.float32(s) * (x - delta)   # (TILE_N, C_pad)

        # cross entropy: logsumexp - target logit (max-shifted; padded lanes -> exp()=0)
        row_max = jnp.max(scaled, axis=1, keepdims=True)
        lse = jnp.log(jnp.sum(jnp.exp(scaled - row_max), axis=1, keepdims=True)) + row_max
        tgt = jnp.sum(jnp.where(mask, scaled, 0.0), axis=1, keepdims=True)
        per_row = lse - tgt                     # (TILE_N, 1)

        # mask out padded tail rows so the global mean divides by N exactly once
        row_ids = pid * tile_n + jax.lax.broadcasted_iota(jnp.int32, (tn, 1), 0)
        per_row = jnp.where(row_ids < n_valid, per_row, 0.0)

        partial = jnp.sum(per_row)
        # lane-dense, unmasked full-block store of this tile's partial sum
        out_ref[...] = jnp.full(out_ref.shape, partial, dtype=jnp.float32)

    return ldam_kernel


def _choose_tile_n(n: int, c_pad: int, itemsize: int, row_align: int) -> int:
    # Keep each (double-buffered) logits block ~<=2 MiB so tiles fit comfortably in
    # scoped VMEM on every generation (v5e/v6e: 128 MiB physical, v7x: 64 MiB).
    budget = 2 * 1024 * 1024
    t = budget // max(c_pad * itemsize, 1)
    t = max(row_align, min(512, int(t)))
    # don't over-pad tiny batches
    t = min(t, ((n + row_align - 1) // row_align) * row_align)
    return t


def ldam_loss(x, target, m_list, s=30.0, tile_n=None):
    """x: (N, C) logits (any float dtype); target: (N,) int; m_list: (C,) float."""
    n, c = x.shape
    c_pad = ((c + 127) // 128) * 128
    itemsize = jnp.dtype(x.dtype).itemsize
    row_align = max(8, 32 // max(itemsize, 1))   # 8 for f32, 16 for bf16

    if tile_n is None:
        tile_n = _choose_tile_n(n, c_pad, itemsize, row_align)
    tile_n = max(row_align,
                 ((int(tile_n) + row_align - 1) // row_align) * row_align)
    n_pad = ((n + tile_n - 1) // tile_n) * tile_n
    num_tiles = n_pad // tile_n

    # Lane-dense class padding: logits -> -1e30 (finite), margins -> 0.
    x_p = x
    if c_pad > c:
        x_p = jnp.pad(x_p, ((0, 0), (0, c_pad - c)), constant_values=_NEG_BIG)
    if n_pad > n:
        x_p = jnp.pad(x_p, ((0, n_pad - n), (0, 0)))        # dummy rows, masked in-kernel

    t_p = target.reshape(n, 1).astype(jnp.int32)
    if n_pad > n:
        t_p = jnp.pad(t_p, ((0, n_pad - n), (0, 0)))

    m_p = jnp.pad(m_list.astype(jnp.float32).reshape(1, c), ((0, 0), (0, c_pad - c)))

    # TODO(synk): per-class `weight` of F.cross_entropy is not implemented (module uses weight=None)

    partials = pl.pallas_call(
        make_ldam_kernel(float(s), n, tile_n),
        out_shape=jax.ShapeDtypeStruct((num_tiles, 8, 128), jnp.float32),
        grid=(num_tiles,),
        in_specs=[
            pl.BlockSpec((tile_n, c_pad), lambda i: (i, 0)),   # logits, native dtype
            pl.BlockSpec((tile_n, 1), lambda i: (i, 0)),       # targets
            pl.BlockSpec((1, c_pad), lambda i: (0, 0)),        # margins (resident)
        ],
        out_specs=pl.BlockSpec((1, 8, 128), lambda i: (i, 0, 0)),
        compiler_params=pltpu.CompilerParams(
            dimension_semantics=("parallel",)),                # shards tiles across TCs (v7x)
    )(x_p, t_p, m_p)

    return jnp.sum(partials[:, 0, 0]) / jnp.float32(n)


def _reference_ldam(x, target, m_list, s=30.0):
    """Pure-JAX reference for verification."""
    n, c = x.shape
    onehot = jax.nn.one_hot(target, c, dtype=jnp.float32)
    out = x.astype(jnp.float32) - onehot * m_list[None, :].astype(jnp.float32)
    logp = jax.nn.log_softmax(s * out, axis=1)
    return -jnp.mean(jnp.sum(onehot * logp, axis=1))


if __name__ == "__main__":
    key = jax.random.PRNGKey(0)

    num_classes = 16
    max_m = 0.5
    s = 30.0

    # deterministic synthetic imbalanced class-count list, as in __init__
    cls_num_list = np.array([1000, 600, 400, 300, 200, 150, 100, 80,
                             60, 50, 40, 30, 20, 15, 10, 5], dtype=np.float64)
    m_np = 1.0 / np.sqrt(np.sqrt(cls_num_list))
    m_np = m_np * (max_m / np.max(m_np))
    m_list = jnp.asarray(m_np, dtype=jnp.float32)

    kx, kt, kx2, kt2 = jax.random.split(key, 4)

    # --- test 1: small f32 case (single tile) ---
    batch = 8
    x = jax.random.normal(kx, (batch, num_classes), dtype=jnp.float32)
    target = jax.random.randint(kt, (batch,), 0, num_classes, dtype=jnp.int32)

    loss = ldam_loss(x, target, m_list, s=s)
    jax.block_until_ready(loss)
    ref = _reference_ldam(x, target, m_list, s=s)
    np.testing.assert_allclose(np.asarray(loss), np.asarray(ref), rtol=1e-5, atol=1e-5)

    # --- test 2: multi-tile grid with padded batch tail (N=20, TILE_N=8 -> 3 tiles) ---
    batch2 = 20
    x2 = jax.random.normal(kx2, (batch2, num_classes), dtype=jnp.float32)
    target2 = jax.random.randint(kt2, (batch2,), 0, num_classes, dtype=jnp.int32)

    loss2 = ldam_loss(x2, target2, m_list, s=s, tile_n=8)
    jax.block_until_ready(loss2)
    ref2 = _reference_ldam(x2, target2, m_list, s=s)
    np.testing.assert_allclose(np.asarray(loss2), np.asarray(ref2), rtol=1e-5, atol=1e-5)

    # --- test 3: native bf16 logits stream through HBM, cast to f32 in-kernel ---
    x3 = x2.astype(jnp.bfloat16)
    loss3 = ldam_loss(x3, target2, m_list, s=s, tile_n=8)
    jax.block_until_ready(loss3)
    ref3 = _reference_ldam(x3.astype(jnp.float32), target2, m_list, s=s)
    np.testing.assert_allclose(np.asarray(loss3), np.asarray(ref3), rtol=1e-5, atol=1e-5)

    print("KERNEL_OK")
</pallas_src>

<mosaic_0001>
module attributes {stable_mosaic.version = 11 : i64} {
  func.func @ldam_kernel(%arg0: i32, %arg1: memref<8x128xf32, #tpu.memory_space<vmem>>, %arg2: memref<8x1xi32, #tpu.memory_space<vmem>>, %arg3: memref<1x128xf32, #tpu.memory_space<vmem>>, %arg4: memref<1x8x128xf32, #tpu.memory_space<vmem>>) attributes {dimension_semantics = [#tpu.dimension_semantics<parallel>], iteration_bounds = array<i64: 1>, scalar_prefetch = 0 : i64, scratch_operands = 0 : i64, tpu.core_type = #tpu.core_type<tc>, window_params = [{transform_indices = @transform_0, window_bounds = array<i64: 8, 128>}, {transform_indices = @transform_1, window_bounds = array<i64: 8, 1>}, {pipeline_mode = #tpu.pipeline_mode<synchronous>, transform_indices = @transform_2, window_bounds = array<i64: 1, 128>}, {transform_indices = @transform_3, window_bounds = array<i64: 1, 8, 128>}]} {
    %c0 = arith.constant 0 : index
    %c0_0 = arith.constant 0 : index
    %0 = vector.load %arg1[%c0, %c0_0] : memref<8x128xf32, #tpu.memory_space<vmem>>, vector<8x128xf32>
    %c0_1 = arith.constant 0 : index
    %c0_2 = arith.constant 0 : index
    %1 = vector.load %arg2[%c0_1, %c0_2] : memref<8x1xi32, #tpu.memory_space<vmem>>, vector<8x1xi32>
    %c0_3 = arith.constant 0 : index
    %c0_4 = arith.constant 0 : index
    %2 = vector.load %arg3[%c0_3, %c0_4] : memref<1x128xf32, #tpu.memory_space<vmem>>, vector<1x128xf32>
    %3 = tpu.iota {dimensions = array<i32: 1>} : vector<8x128xi32>
    %4 = vector.broadcast %1 : vector<8x1xi32> to vector<8x128xi32>
    %5 = arith.cmpi eq, %3, %4 : vector<8x128xi32>
    %cst = arith.constant 0.000000e+00 : f32
    %6 = vector.shape_cast %2 : vector<1x128xf32> to vector<1x128xf32>
    %7 = vector.broadcast %6 : vector<1x128xf32> to vector<8x128xf32>
    %8 = vector.broadcast %cst : f32 to vector<8x128xf32>
    %9 = arith.select %5, %7, %8 : vector<8x128xi1>, vector<8x128xf32>
    %10 = arith.subf %0, %9 : vector<8x128xf32>
    %cst_5 = arith.constant 3.000000e+01 : f32
    %11 = vector.broadcast %cst_5 : f32 to vector<8x128xf32>
    %12 = arith.mulf %11, %10 : vector<8x128xf32>
    %cst_6 = arith.constant dense<0xFF800000> : vector<8xf32>
    %13 = vector.multi_reduction <maximumf>, %12, %cst_6 [1] : vector<8x128xf32> to vector<8xf32>
    %14 = vector.shape_cast %13 : vector<8xf32> to vector<8x1xf32>
    %15 = vector.broadcast %14 : vector<8x1xf32> to vector<8x128xf32>
    %16 = arith.subf %12, %15 : vector<8x128xf32>
    %17 = math.exp %16 : vector<8x128xf32>
    %cst_7 = arith.constant dense<0.000000e+00> : vector<8xf32>
    %18 = vector.multi_reduction <add>, %17, %cst_7 [1] : vector<8x128xf32> to vector<8xf32>
    %19 = vector.shape_cast %18 : vector<8xf32> to vector<8x1xf32>
    %20 = math.log %19 : vector<8x1xf32>
    %21 = arith.addf %20, %14 : vector<8x1xf32>
    %cst_8 = arith.constant 0.000000e+00 : f32
    %22 = vector.broadcast %cst_8 : f32 to vector<8x128xf32>
    %23 = arith.select %5, %12, %22 : vector<8x128xi1>, vector<8x128xf32>
    %cst_9 = arith.constant dense<0.000000e+00> : vector<8xf32>
    %24 = vector.multi_reduction <add>, %23, %cst_9 [1] : vector<8x128xf32> to vector<8xf32>
    %25 = vector.shape_cast %24 : vector<8xf32> to vector<8x1xf32>
    %26 = arith.subf %21, %25 : vector<8x1xf32>
    %c8_i32 = arith.constant 8 : i32
    %27 = arith.muli %arg0, %c8_i32 : i32
    %28 = tpu.iota {dimensions = array<i32: 0>} : vector<8x1xi32>
    %29 = vector.broadcast %27 : i32 to vector<8x1xi32>
    %30 = arith.addi %29, %28 : vector<8x1xi32>
    %c8_i32_10 = arith.constant 8 : i32
    %31 = vector.broadcast %c8_i32_10 : i32 to vector<8x1xi32>
    %32 = arith.cmpi slt, %30, %31 : vector<8x1xi32>
    %cst_11 = arith.constant 0.000000e+00 : f32
    %33 = vector.broadcast %cst_11 : f32 to vector<8x1xf32>
    %34 = arith.select %32, %26, %33 : vector<8x1xi1>, vector<8x1xf32>
    %35 = vector.shape_cast %34 : vector<8x1xf32> to vector<1x8x1xf32>
    %cst_12 = arith.constant dense<0.000000e+00> : vector<1xf32>
    %36 = vector.multi_reduction <add>, %35, %cst_12 [1, 2] : vector<1x8x1xf32> to vector<1xf32>
    %37 = vector.shape_cast %36 : vector<1xf32> to vector<1x1x1xf32>
    %38 = vector.extract %37[0, 0, 0] : f32 from vector<1x1x1xf32>
    %39 = vector.broadcast %38 : f32 to vector<1x8x128xf32>
    %c0_13 = arith.constant 0 : index
    %c0_14 = arith.constant 0 : index
    %c0_15 = arith.constant 0 : index
    %40 = vector.load %arg4[%c0_13, %c0_14, %c0_15] : memref<1x8x128xf32, #tpu.memory_space<vmem>>, vector<1x8x128xf32>
    tpu.vector_store %arg4[%c0_13, %c0_14, %c0_15], %39 {strides = array<i32>} : memref<1x8x128xf32, #tpu.memory_space<vmem>>, vector<1x8x128xf32>,
    return
  }
  func.func @transform_0(%arg0: i32) -> (i32, i32) {
    %c0_i32 = arith.constant 0 : i32
    %c0_i32_0 = arith.constant 0 : i32
    return %arg0, %c0_i32 : i32, i32
  }
  func.func @transform_1(%arg0: i32) -> (i32, i32) {
    %c0_i32 = arith.constant 0 : i32
    %c0_i32_0 = arith.constant 0 : i32
    return %arg0, %c0_i32 : i32, i32
  }
  func.func @transform_2(%arg0: i32) -> (i32, i32) {
    %c0_i32 = arith.constant 0 : i32
    %c0_i32_0 = arith.constant 0 : i32
    %c0_i32_1 = arith.constant 0 : i32
    return %c0_i32, %c0_i32_0 : i32, i32
  }
  func.func @transform_3(%arg0: i32) -> (i32, i32, i32) {
    %c0_i32 = arith.constant 0 : i32
    %c0_i32_0 = arith.constant 0 : i32
    %c0_i32_1 = arith.constant 0 : i32
    return %arg0, %c0_i32, %c0_i32_0 : i32, i32, i32
  }
}

</mosaic_0001>

<bundles_post_ra>
// kernel: tpu_custom_call.1
= control target key start
LH: loop header
LB: loop body
LE: loop exit
PB: predicated region body
PF: predicated region fallthrough
CT: control target
= control target key end

     0   :  { %s158_s0 = inlined_call_operand.vmem [shape: f32[8,128], index: 0, kind: input, shape index: {}]   ;;  %s159_s1 = inlined_call_operand.vmem [shape: s32[8,1], index: 1, kind: input, shape index: {}]   ;;  %s160_s2 = inlined_call_operand.vmem [shape: f32[1,128], index: 2, kind: input, shape index: {}]   ;;  %s161_s3 = inlined_call_operand.hbm [shape: f32[1,8,128], index: 3, kind: output, shape index: {}]  }
   0x1   :  { %v16_v0 = vld [vmem:[%s159_s1] sm:$0xff] }
   0x2   :  { %8 = vsyncpa [#allocation3], 0  ;;  %v115_v1 = vmov 0   ;;  %v18_v2 = vlaneseq  ;;  %v81_v4 = vld [vmem:[%s160_s2] ss:$0 sm:$0xff]  ;;  %vm54_vm1 = vcmask 7168  }
   0x3   :  { %86 = vset.pattern.permute.xlu0 %v115_v1  ;;  %v15_v6 = vld [vmem:[%s158_s0] sm:$0xff]  ;;  %s116_s0 = smov [#allocation2]  }
   0x4   :  { %21 = vperm.xlu0 %86, %v16_v0   ;;  %v19_v3 = vand.u32 127, %v18_v2  ;;  %s73_s1 = sshll.u32 %s116_s0, 4  ;;  %s74_s1 = int_to_ptr.vmem [resolvable:$true] %s73_s1 }
   0x5   :  { %s91_s18 = scalar_lea.vmem %s74_s1, 128  ;;  %p96_p1 = scmp.lt.s32.totalorder %s74_s1, %s74_s1 }
   0x6   :  { %p92_p0 = scmp.ne.s32.totalorder %s74_s1, %s91_s18  ;;  %p97_p2 = scmp.lt.s32.totalorder %s91_s18, %s91_s18 }
   0x8   :  { %p98_p3 = por %p97_p2, %p96_p1 }
   0xa   :  { %p99_p4 = pnand %p98_p3, %p92_p0 }
  0x83   :  { %v22_v5 = vpop.permute.xlu0 %21 }
  0x84   :  { %vm23_vm0 = vcmp.eq.s32.totalorder %v19_v3, %v22_v5 }
  0x85   :  { %v30_v7 = vsel %vm23_vm0, %v81_v4, 0.0 }
  0x86   :  { %v31_v8 = vsub.f32 %v15_v6, %v30_v7 }
  0x88   :  { %v32_v9 = vmul.f32 30.0, %v31_v8 }
  0x8a   :  { %33 = vmax.xlane.f32.xlu0 %v32_v9  ;;  %v43_v14 = vsel %vm23_vm0, %v32_v9, 0.0 }
 0x117   :  { %v34_v10 = vpop.xlane.xlu0 %33 }
 0x118   :  { %v35_v11 = vsub.f32 %v32_v9, %v34_v10 }
 0x11a   :  { %v36_v12 = vmul.f32 1.442695, %v35_v11 }
 0x11c   :  { %87 = vpow2.f32 %v36_v12 }
 0x126   :  { %v88_v13 = vpop.eup %87 }
 0x127   :  { %38 = vadd.xlane.f32.xlu1 %v88_v13 }
 0x12b   :  { %44 = vadd.xlane.f32.xlu1 %v43_v14 }
 0x1b4   :  { %v39_v15 = vpop.xlane.xlu1 %38 }
 0x1b5   :  { %89 = vlog2.f32 %v39_v15 }
 0x1b8   :  { %v45_v19 = vpop.xlane.xlu1 %44 }
 0x1bf   :  { %v90_v16 = vpop.eup %89 }
 0x1c0   :  { %v41_v17 = vmul.f32 0.6931472, %v90_v16 }
 0x1c2   :  { %v42_v18 = vadd.f32 %v41_v17, %v34_v10 }
 0x1c4   :  { %v46_v20 = vsub.f32 %v42_v18, %v45_v19 }
 0x1c6   :  { %v55_v21 = vsel %vm54_vm1, %v46_v20, 0.0 }
 0x1c7   :  { %56 = vadd.xlane.f32.xlu1 %v55_v21 }
 0x254   :  { %v57_v22 = vpop.xlane.xlu1 %56 }
 0x255   :  { %v58_v23 = vrot.slane %v57_v22, 4 }
 0x257   :  { %v59_v24 = vadd.f32 %v58_v23, %v57_v22 }
 0x259   :  { %v60_v25 = vrot.slane %v59_v24, 2 }
 0x25b   :  { %v61_v26 = vadd.f32 %v60_v25, %v59_v24 }
 0x25d   :  { %v62_v27 = vrot.slane %v61_v26, 1 }
 0x25f   :  { %v63_v28 = vadd.f32 %v62_v27, %v61_v26 }
 0x261   :  { %82 = vpush %v63_v28 }
 0x292   :  { %s83_s2 = spop %82 }
 0x293   :  { %v65_v29 = vstv %s83_s2 }
 0x294   :  { %66 = vst [vmem:[#allocation2] sm:$0xff] %v65_v29 }
 0x295   :  { %102 = shalt.err (!%p99_p4)
}
 0x296   :  { %s103_s21 = scalar_lea.hbm %s161_s3, 128 }
 0x297   :  { %p104_p5 = scmp.ne.s32.totalorder %s161_s3, %s103_s21  ;;  %p107_p6 = scmp.lt.u32.totalorder %s103_s21, %s161_s3 }
 0x299   :  { %p109_p7 = pnand %p107_p6, %p104_p5 }
 0x29b   :  { %112 = shalt.err (!%p109_p7)
}
 0x29c   :  { %76 = dma.vmem_to_hbm [thread:$0]  %s74_s1, 128, %s161_s3, [#allocation3]  }
 0x29d   :  { %113 = dma.done.wait [#allocation3], 128  }
 0x29e   :  { %114 = vsyncadd [#allocation3], 4294967168 }
 0x29f   :  { %80 = vsyncpa [#allocation3], 1 }

</bundles_post_ra>
